<compile_context>
chip_gen: v7x
topology: tpu7x:2x2x1
jax: 0.10.0
libtpu: 0.0.40
codegen_flags: <defaults>
</compile_context>

<pallas_src>
import functools

import jax
import jax.numpy as jnp
from jax.experimental import pallas as pl
from jax.experimental.pallas import tpu as pltpu


def _round_up(x, m):
    return (x + m - 1) // m * m


def _pad2d(x, rows, cols, dtype=None):
    r, c = x.shape
    y = jnp.pad(x, ((0, rows - r), (0, cols - c)))
    return y.astype(dtype) if dtype is not None else y


def _choose_tiles(n, target_m=512, target_k=1024):
    """Pick (n_pad, tile_m, tile_k): big tiles, minimal padding, tiles divide n_pad."""
    if n <= 512:
        n_pad = _round_up(max(n, 8), 128)
    else:
        n_pad = _round_up(n, 512)
    # Reduction tile: as large as possible (up to target_k) and dividing n_pad.
    tile_k = min(target_k, n_pad)
    while n_pad % tile_k:
        tile_k -= 128
    # M tile: up to target_m, but keep >= 2 tiles along the parallel axis when
    # possible so v7x's two TensorCores both get work.
    tile_m = min(target_m, n_pad)
    if n_pad // tile_m < 2 and n_pad >= 256:
        tile_m = n_pad // 2
    while n_pad % tile_m:
        tile_m -= 8
    return n_pad, tile_m, tile_k


# --------------------------------------------------------------------------
# Kernel: one Aggregator layer, tiled over (M tiles, K reduction tiles).
# --------------------------------------------------------------------------
def _aggregator_kernel(nodes_ref, adj_ref, stream_ref, *rest,
                       apply_relu: bool, order_b: bool):
    # stream_ref is Last_Hidden (mode A) or X = Last_Hidden @ W2 (mode B).
    if order_b:
        w1_ref, w2_ref, out_ref, acc_ref = rest
    else:
        w1_ref, out_ref, acc_ref = rest
        w2_ref = None

    k = pl.program_id(1)

    @pl.when(k == 0)
    def _init():
        acc_ref[...] = jnp.zeros_like(acc_ref)

    # Per-step: stream an adjacency tile; bf16 x bf16 -> f32 accumulate (MXU).
    acc_ref[...] += jnp.dot(adj_ref[...], stream_ref[...],
                            preferred_element_type=jnp.float32)

    @pl.when(k == pl.num_programs(1) - 1)
    def _epilogue():
        # Tiny "own" matmul issued once per M tile; bf16 x bf16 -> f32.
        own = jnp.dot(nodes_ref[...], w1_ref[...],
                      preferred_element_type=jnp.float32)
        if order_b:
            aggre = jnp.dot(acc_ref[...].astype(jnp.bfloat16), w2_ref[...],
                            preferred_element_type=jnp.float32)
        else:
            aggre = acc_ref[...]
        h = own + aggre
        if apply_relu:
            h = jnp.maximum(h, 0.0)
        out_ref[...] = h.astype(out_ref.dtype)


def aggregator_layer_padded(nodes_p, adj_p, last_p, w1_p, w2_p, *,
                            apply_relu: bool, out_dtype, tile_m: int,
                            tile_k: int):
    """One Aggregator layer on pre-padded, lane-dense bf16 inputs."""
    n_pad, f_in_pad = nodes_p.shape
    f_layer_pad, f_out_pad = w2_p.shape
    assert adj_p.shape == (n_pad, n_pad)
    assert last_p.shape == (n_pad, f_layer_pad)
    assert n_pad % tile_m == 0 and n_pad % tile_k == 0

    # Pick association order so the N^2 matmul uses the narrower inner width.
    order_b = f_layer_pad <= f_out_pad
    if order_b:
        stream_p = last_p                       # (n_pad, f_layer_pad)
        acc_width = f_layer_pad
    else:
        # Hoist X = Last_Hidden @ W2 out of the grid (it is M-independent),
        # instead of recomputing it once per (M tile, k step).
        stream_p = jnp.dot(last_p, w2_p,
                           preferred_element_type=jnp.float32
                           ).astype(jnp.bfloat16)          # (n_pad, f_out_pad)
        acc_width = f_out_pad
    stream_width = stream_p.shape[1]

    in_specs = [
        # nodes: constant across k -> fetched once per M tile
        pl.BlockSpec((tile_m, f_in_pad), lambda i, k: (i, 0)),
        # adjacency: the large per-step stream
        pl.BlockSpec((tile_m, tile_k), lambda i, k: (i, k)),
        # last hidden (or X): streams along the reduction axis
        pl.BlockSpec((tile_k, stream_width), lambda i, k: (k, 0)),
        # W1: full block, resident for the whole grid
        pl.BlockSpec((f_in_pad, f_out_pad), lambda i, k: (0, 0)),
    ]
    inputs = [nodes_p, adj_p, stream_p, w1_p]
    if order_b:
        in_specs.append(pl.BlockSpec((f_layer_pad, f_out_pad),
                                     lambda i, k: (0, 0)))
        inputs.append(w2_p)

    kernel = functools.partial(_aggregator_kernel,
                               apply_relu=apply_relu, order_b=order_b)
    grid = (n_pad // tile_m, n_pad // tile_k)

    return pl.pallas_call(
        kernel,
        out_shape=jax.ShapeDtypeStruct((n_pad, f_out_pad), out_dtype),
        grid_spec=pltpu.PrefetchScalarGridSpec(
            num_scalar_prefetch=0,
            grid=grid,
            in_specs=in_specs,
            out_specs=pl.BlockSpec((tile_m, f_out_pad), lambda i, k: (i, 0)),
            scratch_shapes=[pltpu.VMEM((tile_m, acc_width), jnp.float32)],
        ),
        compiler_params=pltpu.CompilerParams(
            dimension_semantics=("parallel", "arbitrary"),
            vmem_limit_bytes=48 * 1024 * 1024,
        ),
    )(*inputs)


# --------------------------------------------------------------------------
# Parameter init (mimics torch kaiming_uniform_, fan_in = shape[1]).
# --------------------------------------------------------------------------
def kaiming_uniform(key, shape):
    fan_in = shape[1]
    bound = jnp.sqrt(6.0 / fan_in)
    return jax.random.uniform(key, shape, jnp.float32, minval=-bound, maxval=bound)


def init_spatial_gcn_params(key, input_dims, hidden_dims):
    """hidden_dims = [num_layers, h1, h2, ...] exactly as in the PyTorch module."""
    num_layers = hidden_dims[0]
    params = []
    key, k1, k2 = jax.random.split(key, 3)
    params.append((kaiming_uniform(k1, (input_dims, hidden_dims[1])),
                   kaiming_uniform(k2, (input_dims, hidden_dims[1]))))
    for i in range(1, num_layers):
        key, k1, k2 = jax.random.split(key, 3)
        params.append((kaiming_uniform(k1, (input_dims, hidden_dims[i + 1])),
                       kaiming_uniform(k2, (hidden_dims[i], hidden_dims[i + 1]))))
    return params


# --------------------------------------------------------------------------
# Forward pass: pad once, run layers, crop once.
# --------------------------------------------------------------------------
def spatial_gcn_forward(nodes, adj, last_hidden, params):
    n, f_in = nodes.shape
    n_pad, tile_m, tile_k = _choose_tiles(n)
    f_in_pad = _round_up(f_in, 128)

    # Pad ONCE for the whole stack; all streams (and weights) in bf16,
    # accumulation stays f32 inside the kernel.
    nodes_p = _pad2d(nodes, n_pad, f_in_pad, jnp.bfloat16)
    adj_p = _pad2d(adj, n_pad, n_pad, jnp.bfloat16)
    h = _pad2d(last_hidden, n_pad, _round_up(last_hidden.shape[1], 128),
               jnp.bfloat16)

    num_layers = len(params)
    out_p = None
    f_out = None
    for layer, (w1, w2) in enumerate(params):
        f_layer, f_out = w2.shape
        f_layer_pad = _round_up(f_layer, 128)
        f_out_pad = _round_up(f_out, 128)
        assert h.shape[1] == f_layer_pad
        w1_p = _pad2d(w1, f_in_pad, f_out_pad, jnp.bfloat16)
        w2_p = _pad2d(w2, f_layer_pad, f_out_pad, jnp.bfloat16)
        is_last = layer == num_layers - 1
        out_p = aggregator_layer_padded(
            nodes_p, adj_p, h, w1_p, w2_p,
            apply_relu=(layer == 0),
            out_dtype=jnp.float32 if is_last else jnp.bfloat16,
            tile_m=tile_m, tile_k=tile_k)
        h = out_p   # intermediate layers already emit bf16 from the kernel
    # Crop padding; final output is f32 like the PyTorch module.
    return out_p[:n, :f_out]


def spatial_gcn_reference(nodes, adj, last_hidden, params):
    h = last_hidden
    for layer, (w1, w2) in enumerate(params):
        h = nodes @ w1 + adj @ (h @ w2)
        if layer == 0:
            h = jnp.maximum(h, 0.0)
    return h


if __name__ == "__main__":
    key = jax.random.PRNGKey(0)

    # Small-but-non-trivial shapes: exercises tiling (multiple M tiles),
    # feature-dim padding (48/160/64 -> 128/256/128 lanes) and BOTH
    # association orders (layer 0: mode A, layer 1: mode B via hoisted X).
    N = 256
    input_dims = 48
    hidden_dims = [2, 160, 64]   # 2 layers: 48 -> 160 (ReLU) -> 64

    k_nodes, k_adj, k_last, k_params = jax.random.split(key, 4)
    nodes = jax.random.normal(k_nodes, (N, input_dims), jnp.float32)
    adj = jax.random.normal(k_adj, (N, N), jnp.float32)
    last_hidden = jax.random.normal(k_last, (N, input_dims), jnp.float32)

    params = init_spatial_gcn_params(k_params, input_dims, hidden_dims)

    fwd = jax.jit(spatial_gcn_forward)
    out = jax.block_until_ready(fwd(nodes, adj, last_hidden, params))

    ref = spatial_gcn_reference(nodes, adj, last_hidden, params)
    assert out.shape == (N, hidden_dims[-1]), out.shape

    # bf16 streams/weights with f32 accumulation: max-norm relative bound.
    max_err = float(jnp.max(jnp.abs(out - ref)))
    scale = float(jnp.max(jnp.abs(ref)))
    assert max_err <= 4e-2 * scale, (max_err, scale)

    print("KERNEL_OK")
</pallas_src>

<mosaic_0001>
module attributes {stable_mosaic.version = 11 : i64} {
  func.func @_aggregator_kernel(%arg0: i32, %arg1: i32, %arg2: memref<128x128xbf16, #tpu.memory_space<vmem>>, %arg3: memref<128x256xbf16, #tpu.memory_space<vmem>>, %arg4: memref<256x128xbf16, #tpu.memory_space<vmem>>, %arg5: memref<128x256xbf16, #tpu.memory_space<vmem>>, %arg6: memref<128x256xbf16, #tpu.memory_space<vmem>>, %arg7: memref<128x256xbf16, #tpu.memory_space<vmem>>, %arg8: memref<128x128xf32, #tpu.memory_space<vmem>>) attributes {dimension_semantics = [#tpu.dimension_semantics<parallel>, #tpu.dimension_semantics<arbitrary>], iteration_bounds = array<i64: 2, 1>, scalar_prefetch = 0 : i64, scratch_operands = 1 : i64, tpu.core_type = #tpu.core_type<tc>, window_params = [{transform_indices = @transform_0, window_bounds = array<i64: 128, 128>}, {transform_indices = @transform_1, window_bounds = array<i64: 128, 256>}, {transform_indices = @transform_2, window_bounds = array<i64: 256, 128>}, {pipeline_mode = #tpu.pipeline_mode<synchronous>, transform_indices = @transform_3, window_bounds = array<i64: 128, 256>}, {pipeline_mode = #tpu.pipeline_mode<synchronous>, transform_indices = @transform_4, window_bounds = array<i64: 128, 256>}, {transform_indices = @transform_5, window_bounds = array<i64: 128, 256>}]} {
    %c0_i32 = arith.constant 0 : i32
    %0 = arith.cmpi eq, %arg1, %c0_i32 : i32
    %1 = arith.extui %0 : i1 to i32
    %c0_i32_0 = arith.constant 0 : i32
    %2 = arith.cmpi ne, %1, %c0_i32_0 : i32
    scf.if %2 {
      %cst_10 = arith.constant 0.000000e+00 : f32
      %12 = vector.broadcast %cst_10 : f32 to vector<128x128xf32>
      %c0_11 = arith.constant 0 : index
      %c0_12 = arith.constant 0 : index
      %13 = vector.load %arg8[%c0_11, %c0_12] : memref<128x128xf32, #tpu.memory_space<vmem>>, vector<128x128xf32>
      tpu.vector_store %arg8[%c0_11, %c0_12], %12 {strides = array<i32>} : memref<128x128xf32, #tpu.memory_space<vmem>>, vector<128x128xf32>,
    } else {
    }
    %c0 = arith.constant 0 : index
    %c0_1 = arith.constant 0 : index
    %3 = vector.load %arg8[%c0, %c0_1] : memref<128x128xf32, #tpu.memory_space<vmem>>, vector<128x128xf32>
    %c0_2 = arith.constant 0 : index
    %c0_3 = arith.constant 0 : index
    %4 = vector.load %arg3[%c0_2, %c0_3] : memref<128x256xbf16, #tpu.memory_space<vmem>>, vector<128x256xbf16>
    %c0_4 = arith.constant 0 : index
    %c0_5 = arith.constant 0 : index
    %5 = vector.load %arg4[%c0_4, %c0_5] : memref<256x128xbf16, #tpu.memory_space<vmem>>, vector<256x128xbf16>
    %cst = arith.constant dense<0.000000e+00> : vector<128x128xf32>
    %6 = tpu.matmul %4, %5, %cst {dimension_numbers = #tpu.dot_dimension_numbers<[1], [0], [0], [1], [0, 0, 1, 1], [], []>} : vector<128x256xbf16>, vector<256x128xbf16>, vector<128x128xf32> -> vector<128x128xf32>
    %7 = arith.addf %3, %6 : vector<128x128xf32>
    %c0_6 = arith.constant 0 : index
    %c0_7 = arith.constant 0 : index
    %8 = vector.load %arg8[%c0_6, %c0_7] : memref<128x128xf32, #tpu.memory_space<vmem>>, vector<128x128xf32>
    tpu.vector_store %arg8[%c0_6, %c0_7], %7 {strides = array<i32>} : memref<128x128xf32, #tpu.memory_space<vmem>>, vector<128x128xf32>,
    %c0_i32_8 = arith.constant 0 : i32
    %9 = arith.cmpi eq, %arg1, %c0_i32_8 : i32
    %10 = arith.extui %9 : i1 to i32
    %c0_i32_9 = arith.constant 0 : i32
    %11 = arith.cmpi ne, %10, %c0_i32_9 : i32
    scf.if %11 {
      %c0_10 = arith.constant 0 : index
      %c0_11 = arith.constant 0 : index
      %12 = vector.load %arg2[%c0_10, %c0_11] : memref<128x128xbf16, #tpu.memory_space<vmem>>, vector<128x128xbf16>
      %c0_12 = arith.constant 0 : index
      %c0_13 = arith.constant 0 : index
      %13 = vector.load %arg5[%c0_12, %c0_13] : memref<128x256xbf16, #tpu.memory_space<vmem>>, vector<128x256xbf16>
      %cst_14 = arith.constant dense<0.000000e+00> : vector<128x256xf32>
      %14 = tpu.matmul %12, %13, %cst_14 {dimension_numbers = #tpu.dot_dimension_numbers<[1], [0], [0], [1], [0, 0, 1, 1], [], []>} : vector<128x128xbf16>, vector<128x256xbf16>, vector<128x256xf32> -> vector<128x256xf32>
      %c0_15 = arith.constant 0 : index
      %c0_16 = arith.constant 0 : index
      %15 = vector.load %arg8[%c0_15, %c0_16] : memref<128x128xf32, #tpu.memory_space<vmem>>, vector<128x128xf32>
      %16 = arith.truncf %15 : vector<128x128xf32> to vector<128x128xbf16>
      %c0_17 = arith.constant 0 : index
      %c0_18 = arith.constant 0 : index
      %17 = vector.load %arg6[%c0_17, %c0_18] : memref<128x256xbf16, #tpu.memory_space<vmem>>, vector<128x256xbf16>
      %cst_19 = arith.constant dense<0.000000e+00> : vector<128x256xf32>
      %18 = tpu.matmul %16, %17, %cst_19 {dimension_numbers = #tpu.dot_dimension_numbers<[1], [0], [0], [1], [0, 0, 1, 1], [], []>} : vector<128x128xbf16>, vector<128x256xbf16>, vector<128x256xf32> -> vector<128x256xf32>
      %19 = arith.addf %14, %18 : vector<128x256xf32>
      %cst_20 = arith.constant 0.000000e+00 : f32
      %20 = vector.broadcast %cst_20 : f32 to vector<128x256xf32>
      %21 = arith.maximumf %19, %20 : vector<128x256xf32>
      %22 = arith.truncf %21 : vector<128x256xf32> to vector<128x256xbf16>
      %c0_21 = arith.constant 0 : index
      %c0_22 = arith.constant 0 : index
      %23 = vector.load %arg7[%c0_21, %c0_22] : memref<128x256xbf16, #tpu.memory_space<vmem>>, vector<128x256xbf16>
      tpu.vector_store %arg7[%c0_21, %c0_22], %22 {strides = array<i32>} : memref<128x256xbf16, #tpu.memory_space<vmem>>, vector<128x256xbf16>,
    } else {
    }
    return
  }
  func.func @transform_0(%arg0: i32, %arg1: i32) -> (i32, i32) {
    %c0_i32 = arith.constant 0 : i32
    %c0_i32_0 = arith.constant 0 : i32
    return %arg0, %c0_i32 : i32, i32
  }
  func.func @transform_1(%arg0: i32, %arg1: i32) -> (i32, i32) {
    %c0_i32 = arith.constant 0 : i32
    return %arg0, %arg1 : i32, i32
  }
  func.func @transform_2(%arg0: i32, %arg1: i32) -> (i32, i32) {
    %c0_i32 = arith.constant 0 : i32
    %c0_i32_0 = arith.constant 0 : i32
    return %arg1, %c0_i32 : i32, i32
  }
  func.func @transform_3(%arg0: i32, %arg1: i32) -> (i32, i32) {
    %c0_i32 = arith.constant 0 : i32
    %c0_i32_0 = arith.constant 0 : i32
    %c0_i32_1 = arith.constant 0 : i32
    return %c0_i32, %c0_i32_0 : i32, i32
  }
  func.func @transform_4(%arg0: i32, %arg1: i32) -> (i32, i32) {
    %c0_i32 = arith.constant 0 : i32
    %c0_i32_0 = arith.constant 0 : i32
    %c0_i32_1 = arith.constant 0 : i32
    return %c0_i32, %c0_i32_0 : i32, i32
  }
  func.func @transform_5(%arg0: i32, %arg1: i32) -> (i32, i32) {
    %c0_i32 = arith.constant 0 : i32
    %c0_i32_0 = arith.constant 0 : i32
    return %arg0, %c0_i32 : i32, i32
  }
}

module attributes {stable_mosaic.version = 11 : i64} {
  func.func @_aggregator_kernel(%arg0: i32, %arg1: i32, %arg2: memref<128x128xbf16, #tpu.memory_space<vmem>>, %arg3: memref<128x256xbf16, #tpu.memory_space<vmem>>, %arg4: memref<256x128xbf16, #tpu.memory_space<vmem>>, %arg5: memref<128x128xbf16, #tpu.memory_space<vmem>>, %arg6: memref<128x128xf32, #tpu.memory_space<vmem>>, %arg7: memref<128x128xf32, #tpu.memory_space<vmem>>) attributes {dimension_semantics = [#tpu.dimension_semantics<parallel>, #tpu.dimension_semantics<arbitrary>], iteration_bounds = array<i64: 2, 1>, scalar_prefetch = 0 : i64, scratch_operands = 1 : i64, tpu.core_type = #tpu.core_type<tc>, window_params = [{transform_indices = @transform_0, window_bounds = array<i64: 128, 128>}, {transform_indices = @transform_1, window_bounds = array<i64: 128, 256>}, {transform_indices = @transform_2, window_bounds = array<i64: 256, 128>}, {pipeline_mode = #tpu.pipeline_mode<synchronous>, transform_indices = @transform_3, window_bounds = array<i64: 128, 128>}, {transform_indices = @transform_4, window_bounds = array<i64: 128, 128>}]} {
    %c0_i32 = arith.constant 0 : i32
    %0 = arith.cmpi eq, %arg1, %c0_i32 : i32
    %1 = arith.extui %0 : i1 to i32
    %c0_i32_0 = arith.constant 0 : i32
    %2 = arith.cmpi ne, %1, %c0_i32_0 : i32
    scf.if %2 {
      %cst_10 = arith.constant 0.000000e+00 : f32
      %12 = vector.broadcast %cst_10 : f32 to vector<128x128xf32>
      %c0_11 = arith.constant 0 : index
      %c0_12 = arith.constant 0 : index
      %13 = vector.load %arg7[%c0_11, %c0_12] : memref<128x128xf32, #tpu.memory_space<vmem>>, vector<128x128xf32>
      tpu.vector_store %arg7[%c0_11, %c0_12], %12 {strides = array<i32>} : memref<128x128xf32, #tpu.memory_space<vmem>>, vector<128x128xf32>,
    } else {
    }
    %c0 = arith.constant 0 : index
    %c0_1 = arith.constant 0 : index
    %3 = vector.load %arg7[%c0, %c0_1] : memref<128x128xf32, #tpu.memory_space<vmem>>, vector<128x128xf32>
    %c0_2 = arith.constant 0 : index
    %c0_3 = arith.constant 0 : index
    %4 = vector.load %arg3[%c0_2, %c0_3] : memref<128x256xbf16, #tpu.memory_space<vmem>>, vector<128x256xbf16>
    %c0_4 = arith.constant 0 : index
    %c0_5 = arith.constant 0 : index
    %5 = vector.load %arg4[%c0_4, %c0_5] : memref<256x128xbf16, #tpu.memory_space<vmem>>, vector<256x128xbf16>
    %cst = arith.constant dense<0.000000e+00> : vector<128x128xf32>
    %6 = tpu.matmul %4, %5, %cst {dimension_numbers = #tpu.dot_dimension_numbers<[1], [0], [0], [1], [0, 0, 1, 1], [], []>} : vector<128x256xbf16>, vector<256x128xbf16>, vector<128x128xf32> -> vector<128x128xf32>
    %7 = arith.addf %3, %6 : vector<128x128xf32>
    %c0_6 = arith.constant 0 : index
    %c0_7 = arith.constant 0 : index
    %8 = vector.load %arg7[%c0_6, %c0_7] : memref<128x128xf32, #tpu.memory_space<vmem>>, vector<128x128xf32>
    tpu.vector_store %arg7[%c0_6, %c0_7], %7 {strides = array<i32>} : memref<128x128xf32, #tpu.memory_space<vmem>>, vector<128x128xf32>,
    %c0_i32_8 = arith.constant 0 : i32
    %9 = arith.cmpi eq, %arg1, %c0_i32_8 : i32
    %10 = arith.extui %9 : i1 to i32
    %c0_i32_9 = arith.constant 0 : i32
    %11 = arith.cmpi ne, %10, %c0_i32_9 : i32
    scf.if %11 {
      %c0_10 = arith.constant 0 : index
      %c0_11 = arith.constant 0 : index
      %12 = vector.load %arg2[%c0_10, %c0_11] : memref<128x128xbf16, #tpu.memory_space<vmem>>, vector<128x128xbf16>
      %c0_12 = arith.constant 0 : index
      %c0_13 = arith.constant 0 : index
      %13 = vector.load %arg5[%c0_12, %c0_13] : memref<128x128xbf16, #tpu.memory_space<vmem>>, vector<128x128xbf16>
      %cst_14 = arith.constant dense<0.000000e+00> : vector<128x128xf32>
      %14 = tpu.matmul %12, %13, %cst_14 {dimension_numbers = #tpu.dot_dimension_numbers<[1], [0], [0], [1], [0, 0, 1, 1], [], []>} : vector<128x128xbf16>, vector<128x128xbf16>, vector<128x128xf32> -> vector<128x128xf32>
      %c0_15 = arith.constant 0 : index
      %c0_16 = arith.constant 0 : index
      %15 = vector.load %arg7[%c0_15, %c0_16] : memref<128x128xf32, #tpu.memory_space<vmem>>, vector<128x128xf32>
      %16 = arith.addf %14, %15 : vector<128x128xf32>
      %c0_17 = arith.constant 0 : index
      %c0_18 = arith.constant 0 : index
      %17 = vector.load %arg6[%c0_17, %c0_18] : memref<128x128xf32, #tpu.memory_space<vmem>>, vector<128x128xf32>
      tpu.vector_store %arg6[%c0_17, %c0_18], %16 {strides = array<i32>} : memref<128x128xf32, #tpu.memory_space<vmem>>, vector<128x128xf32>,
    } else {
    }
    return
  }
  func.func @transform_0(%arg0: i32, %arg1: i32) -> (i32, i32) {
    %c0_i32 = arith.constant 0 : i32
    %c0_i32_0 = arith.constant 0 : i32
    return %arg0, %c0_i32 : i32, i32
  }
  func.func @transform_1(%arg0: i32, %arg1: i32) -> (i32, i32) {
    %c0_i32 = arith.constant 0 : i32
    return %arg0, %arg1 : i32, i32
  }
  func.func @transform_2(%arg0: i32, %arg1: i32) -> (i32, i32) {
    %c0_i32 = arith.constant 0 : i32
    %c0_i32_0 = arith.constant 0 : i32
    return %arg1, %c0_i32 : i32, i32
  }
  func.func @transform_3(%arg0: i32, %arg1: i32) -> (i32, i32) {
    %c0_i32 = arith.constant 0 : i32
    %c0_i32_0 = arith.constant 0 : i32
    %c0_i32_1 = arith.constant 0 : i32
    return %c0_i32, %c0_i32_0 : i32, i32
  }
  func.func @transform_4(%arg0: i32, %arg1: i32) -> (i32, i32) {
    %c0_i32 = arith.constant 0 : i32
    %c0_i32_0 = arith.constant 0 : i32
    return %arg0, %c0_i32 : i32, i32
  }
}

</mosaic_0001>

<bundles_post_ra>
// kernel: spatial_gcn_forward.3
= control target key start
LH: loop header
LB: loop body
LE: loop exit
PB: predicated region body
PF: predicated region fallthrough
CT: control target
= control target key end

     0   :  { %s1329_s15 = smov 0   ;;  %s1331_s16 = smov 0   ;;  %s1494_s0 = inlined_call_operand.vmem [shape: bf16[256,128], index: 0, kind: input, shape index: {}]   ;;  %s1495_s1 = inlined_call_operand.vmem [shape: bf16[256,256], index: 1, kind: input, shape index: {}]   ;;  %s1496_s2 = inlined_call_operand.vmem [shape: bf16[256,128], index: 2, kind: input, shape index: {}]   ;;  %s1497_s3 = inlined_call_operand.vmem [shape: bf16[128,128], index: 3, kind: input, shape index: {}]   ;;  %s1498_s4 = inlined_call_operand.vmem [shape: f32[256,128], index: 4, kind: output, shape index: {}]  }
   0x1   :  { %s1333_s17 = smov 0  }
   0x2 LB: > { %s26_s18 = sadd.s32 1, %s1298_s16  ;;  %p1029_p0 = scmp.ge.s32.totalorder %s1302_s17, 1  ;;  %s1302_s17 = sphi %s1333_s17, %s14_s17   ;;  %s1298_s16 = sphi %s1331_s16, %s1500_s16   ;;  %s1294_s15 = sphi %s1329_s15, %s1499_s15  }
   0x3   : > { %p28_p1 = scmp.ge.s32.totalorder %s26_s18, 2  ;;  %p205_p2 = scmp.lt.s32.totalorder %s1302_s17, 3 }
   0x5   : > { %s1502_s18 = smov (%p28_p1, %s26_s18), 0  ;;  %p206_p3 = pnand %p1029_p0, %p205_p2 }
   0x6   : > { %v1224_v0 = vld [vmem:[%s1496_s2 + $0x40] sm:$0xff] (!%p206_p3)   ;;  %v1227_v3 = vld [vmem:[%s1496_s2 + $0x48] sm:$0xff] (!%p206_p3)   ;;  %v1230_v6 = vld [vmem:[%s1496_s2 + $0x50] sm:$0xff] (!%p206_p3)   ;;  %s1030_s11 = sshll.u32 (!%p206_p3), %s1294_s15, 4 }
   0x7   : > { %209 = sbr.rel (%p206_p3) target bundleno = 315 (0x13b), region = 36  ;;  %v1225_v1 = vld [vmem:[%s1496_s2] sm:$0xff] (!%p206_p3)   ;;  %1088 = vmatprep.subr.bf16.mxu0 (!%p206_p3), %v1224_v0  ;;  %v1228_v4 = vld [vmem:[%s1496_s2 + $0x8] sm:$0xff] (!%p206_p3)   ;;  %v1231_v7 = vld [vmem:[%s1496_s2 + $0x10] sm:$0xff] (!%p206_p3)   ;;  %p247_p4 = scmp.lt.s32.totalorder (!%p206_p3), %s1030_s11, 31 }
   0x8   : > { %v1226_v2 = vld [vmem:[%s1497_s3] sm:$0xff] (!%p206_p3)   ;;  %1089 = vmatpush3.bf16.msra.mxu0 (!%p206_p3), %v1225_v1  ;;  %v1229_v5 = vld [vmem:[%s1497_s3 + $0x8] sm:$0xff] (!%p206_p3)   ;;  %v1232_v8 = vld [vmem:[%s1497_s3 + $0x10] sm:$0xff] (!%p206_p3)  }
   0x9   : > { %1168 = vmatprep.subr.bf16.mxu1 (!%p206_p3), %v1226_v2  ;;  %1090 = vmatprep.subr.bf16.mxu0 (!%p206_p3), %v1227_v3  ;;  %v1233_v9 = vld [vmem:[%s1496_s2 + $0x58] sm:$0xff] (!%p206_p3)   ;;  %v1236_v12 = vld [vmem:[%s1496_s2 + $0x60] sm:$0xff] (!%p206_p3)   ;;  %v1239_v15 = vld [vmem:[%s1496_s2 + $0x68] sm:$0xff] (!%p206_p3)  }
   0xa   : > { %1169 = vmatpush3.bf16.msra.mxu1 (!%p206_p3), %v1226_v2  ;;  %v1234_v10 = vld [vmem:[%s1496_s2 + $0x18] sm:$0xff] (!%p206_p3)   ;;  %v1238_v13 = vld [vmem:[%s1497_s3 + $0x20] sm:$0xff] (!%p206_p3)   ;;  %v1241_v16 = vld [vmem:[%s1497_s3 + $0x28] sm:$0xff] (!%p206_p3)  }
   0xb   : > { %1170 = vmatprep.subr.bf16.mxu1 (!%p206_p3), %v1229_v5  ;;  %v1235_v11 = vld [vmem:[%s1497_s3 + $0x18] sm:$0xff] (!%p206_p3)   ;;  %v1237_v14 = vld [vmem:[%s1496_s2 + $0x20] sm:$0xff] (!%p206_p3)   ;;  %v1240_v17 = vld [vmem:[%s1496_s2 + $0x28] sm:$0xff] (!%p206_p3)  }
   0xc   : > { %1091 = vmatpush3.bf16.msra.mxu0 (!%p206_p3), %v1228_v4  ;;  %v1242_v18 = vld [vmem:[%s1496_s2 + $0x70] sm:$0xff] (!%p206_p3)   ;;  %v1245_v21 = vld [vmem:[%s1496_s2 + $0x78] sm:$0xff] (!%p206_p3)  }
   0xd   : > { %1092 = vmatprep.subr.bf16.mxu0 (!%p206_p3), %v1230_v6  ;;  %v1243_v19 = vld [vmem:[%s1496_s2 + $0x30] sm:$0xff] (!%p206_p3)   ;;  %v1247_v22 = vld [vmem:[%s1497_s3 + $0x38] sm:$0xff] (!%p206_p3)  }
   0xe   : > { %1171 = vmatpush3.bf16.msra.mxu1 %v1229_v5  ;;  %s1504_s11 = smov (!%p247_p4, %s1030_s11), 31  ;;  %v1244_v20 = vld [vmem:[%s1497_s3 + $0x30] sm:$0xff]   ;;  %v1246_v25 = vld [vmem:[%s1496_s2 + $0x38] sm:$0xff]  }
   0xf   : > { %1172 = vmatprep.subr.bf16.mxu1 %v1232_v8  ;;  %s1087_s7 = sshll.u32 %s1504_s11, 3  ;;  %s1031_s10 = sshll.u32 %s1504_s11, 2 }
  0x10   : > { %1093 = vmatpush3.bf16.msra.mxu0 %v1231_v7  ;;  %s1422_s22 = scalar_lea.vmem %s1495_s1, %s1087_s7  ;;  %s1430_s26 = scalar_lea.vmem %s1494_s0, %s1031_s10 }
  0x11   : > { %1094 = vmatprep.subr.bf16.mxu0 %v1233_v9  ;;  %v1250_v23 = vld [vmem:[%s1422_s22 + $0x4] ss:$8 sps:$4 sm:$0xff]   ;;  %v1248_v26 = vld [vmem:[%s1422_s22] ss:$8 sps:$4 sm:$0xff]   ;;  %v1253_v27 = vld [vmem:[%s1422_s22 + $0x14] ss:$8 sps:$4 sm:$0xff]   ;;  %s1467_s8 = scalar_lea.vmem %s1498_s4, %s1087_s7 }
  0x12   : > { %1173 = vmatpush3.bf16.msra.mxu1 %v1232_v8  ;;  %v1251_v24 = vld [vmem:[%s1430_s26] sm:$0xff]   ;;  %569 = vmatprep.mubr.bf16.mxu0 %v1250_v23  ;;  %v1252_v28 = vld [vmem:[%s1430_s26 + $0x8] sm:$0xff]   ;;  %v1259_v29 = vld [vmem:[%s1430_s26 + $0x10] sm:$0xff]  }
  0x13   : > { %1174 = vmatprep.subr.bf16.mxu1 %v1235_v11  ;;  %1184 = vmatprep.mubr.bf16.mxu1 %v1251_v24  ;;  %v1255_v30 = vld [vmem:[%s1422_s22 + $0x10] ss:$8 sps:$4 sm:$0xff]   ;;  %v1256_v31 = vld [vmem:[%s1422_s22 + $0x24] ss:$8 sps:$4 sm:$0xff]   ;;  %v1258_v34 = vld [vmem:[%s1422_s22 + $0x20] ss:$8 sps:$4 sm:$0xff]  }
  0x14   : > { %1095 = vmatpush3.bf16.msra.mxu0 %v1234_v10  ;;  %v1260_v32 = vld [vmem:[%s1430_s26 + $0x18] sm:$0xff]   ;;  %v1267_v33 = vld [vmem:[%s1430_s26 + $0x20] sm:$0xff]   ;;  %v1268_v36 = vld [vmem:[%s1430_s26 + $0x28] sm:$0xff]  }
  0x15   : > { %1096 = vmatprep.subr.bf16.mxu0 %v1236_v12  ;;  %v1261_v35 = vld [vmem:[%s1422_s22 + $0x34] ss:$8 sps:$4 sm:$0xff]   ;;  %v1263_v38 = vld [vmem:[%s1422_s22 + $0x30] ss:$8 sps:$4 sm:$0xff]   ;;  %v1264_v39 = vld [vmem:[%s1422_s22 + $0x44] ss:$8 sps:$4 sm:$0xff]  }
  0x16   : > { %1175 = vmatpush3.bf16.msra.mxu1 %v1235_v11  ;;  %v1275_v37 = vld [vmem:[%s1430_s26 + $0x30] sm:$0xff]   ;;  %v1276_v40 = vld [vmem:[%s1430_s26 + $0x38] sm:$0xff]   ;;  %v1266_v41 = vld [vmem:[%s1422_s22 + $0x40] ss:$8 sps:$4 sm:$0xff]  }
  0x17   : > { %1176 = vmatprep.subr.bf16.mxu1 %v1238_v13  ;;  %v1269_v42 = vld [vmem:[%s1422_s22 + $0x54] ss:$8 sps:$4 sm:$0xff]   ;;  %v1271_v43 = vld [vmem:[%s1422_s22 + $0x50] ss:$8 sps:$4 sm:$0xff]   ;;  %v1272_v44 = vld [vmem:[%s1422_s22 + $0x64] ss:$8 sps:$4 sm:$0xff]  }
  0x18   : > { %1097 = vmatpush3.bf16.msra.mxu0 %v1237_v14  ;;  %v1274_v45 = vld [vmem:[%s1422_s22 + $0x60] ss:$8 sps:$4 sm:$0xff]   ;;  %v1277_v46 = vld [vmem:[%s1422_s22 + $0x74] ss:$8 sps:$4 sm:$0xff]   ;;  %v1279_v47 = vld [vmem:[%s1422_s22 + $0x70] ss:$8 sps:$4 sm:$0xff]  }
  0x19   : > { %1098 = vmatprep.subr.bf16.mxu0 %v1239_v15 }
  0x1a   : > { %1177 = vmatpush3.bf16.msra.mxu1 %v1238_v13 }
  0x1b   : > { %1178 = vmatprep.subr.bf16.mxu1 %v1241_v16 }
  0x1c   : > { %1099 = vmatpush3.bf16.msra.mxu0 %v1240_v17 }
  0x1d   : > { %1100 = vmatprep.subr.bf16.mxu0 %v1242_v18 }
  0x1e   : > { %1179 = vmatpush3.bf16.msra.mxu1 %v1241_v16 }
  0x1f   : > { %1180 = vmatprep.subr.bf16.mxu1 %v1244_v20 }
  0x20   : > { %1101 = vmatpush3.bf16.msra.mxu0 %v1243_v19 }
  0x21   : > { %1102 = vmatprep.subr.bf16.mxu0 %v1245_v21 }
  0x22   : > { %1181 = vmatpush3.bf16.msra.mxu1 %v1244_v20 }
  0x23   : > { %1182 = vmatprep.subr.bf16.mxu1 %v1247_v22 }
  0x24   : > { %1103 = vmatpush3.bf16.msra.mxu0 %v1246_v25 }
  0x26   : > { %1183 = vmatpush3.bf16.msra.mxu1 %v1247_v22 }
  0x27   : > { %570 = vmatmul.mubr.bf16.vlgmr.msra.gmra.mrb[0].mxu0 %v1248_v26 }
  0x28   : > { %577 = vmatprep.mubr.bf16.mxu0 %v1253_v27 }
  0x29   : > { %1185 = vmatmul.mubr.bf16.vlgmr.msra.gmra.mrb[0].mxu1 %v1252_v28 }
  0x2a   : > { %1188 = vmatprep.mubr.bf16.mxu1 %v1259_v29 }
  0x2f   : > { %578 = vmatmul.mubr.bf16.gmra.mrb[4].mxu0 %v1255_v30 }
  0x30   : > { %585 = vmatprep.mubr.bf16.mxu0 %v1256_v31 }
  0x31   : > { %1189 = vmatmul.mubr.bf16.gmra.mrb[4].mxu1 %v1260_v32 }
  0x32   : > { %1192 = vmatprep.mubr.bf16.mxu1 %v1267_v33 }
  0x37   : > { %586 = vmatmul.mubr.bf16.gmra.mrb[8].mxu0 %v1258_v34 }
  0x38   : > { %593 = vmatprep.mubr.bf16.mxu0 %v1261_v35 }
  0x39   : > { %1193 = vmatmul.mubr.bf16.gmra.mrb[8].mxu1 %v1268_v36 }
  0x3a   : > { %1196 = vmatprep.mubr.bf16.mxu1 %v1275_v37 }
  0x3f   : > { %594 = vmatmul.mubr.bf16.gmra.mrb[12].mxu0 %v1263_v38 }
  0x40   : > { %601 = vmatprep.mubr.bf16.mxu0 %v1264_v39 }
  0x41   : > { %1197 = vmatmul.mubr.bf16.gmra.mrb[12].mxu1 %v1276_v40 }
  0x47   : > { %602 = vmatmul.mubr.bf16.gmra.mrb[16].mxu0 %v1266_v41 }
  0x48   : > { %609 = vmatprep.mubr.bf16.mxu0 %v1269_v42 }
  0x4f   : > { %610 = vmatmul.mubr.bf16.gmra.mrb[20].mxu0 %v1271_v43 }
  0x50   : > { %617 = vmatprep.mubr.bf16.mxu0 %v1272_v44 }
  0x57   : > { %618 = vmatmul.mubr.bf16.gmra.mrb[24].mxu0 %v1274_v45 }
  0x58   : > { %625 = vmatprep.mubr.bf16.mxu0 %v1277_v46 }
  0x5f   : > { %626 = vmatmul.mubr.bf16.gmra.mrb[28].mxu0 %v1279_v47 }
  0xfa   : > { %v1104_v48 = vpop.f32.mrb[0].mxu0 }
  0xfb   : > { %v1105_v49 = vpop.f32.mrb[1].mxu0 }
  0xfc   : > { %v1106_v50 = vadd.f32 %v1105_v49, %v1104_v48  ;;  %v1107_v51 = vpop.f32.mrb[2].mxu0  ;;  %v1186_v52 = vpop.f32.mrb[0].mxu1 }
  0xfd   : > { %v1108_v53 = vpop.f32.mrb[3].mxu0  ;;  %v847_v54 = vpop.f32.mrb[1].mxu1 }
  0xfe   : > { %v1109_v55 = vadd.f32 %v1108_v53, %v1107_v51  ;;  %v848_v56 = vadd.f32 %v1106_v50, %v847_v54  ;;  %v1187_v57 = vpop.f32.mrb[2].mxu1 }
  0xff   : > { %v850_v58 = vpop.f32.mrb[3].mxu1 }
 0x100   : > { %910 = vst [vmem:[%s1467_s8] sm:$0xff] %v848_v56  ;;  %v851_v59 = vadd.f32 %v1109_v55, %v850_v58 }
 0x102   : > { %911 = vst [vmem:[%s1467_s8 + $0x8] sm:$0xff] %v851_v59  ;;  %v1110_v60 = vpop.f32.mrb[4].mxu0 }
 0x103   : > { %v1111_v61 = vpop.f32.mrb[5].mxu0 }
 0x104   : > { %v1112_v62 = vadd.f32 %v1111_v61, %v1110_v60  ;;  %v1113_v63 = vpop.f32.mrb[6].mxu0  ;;  %v1190_v0 = vpop.f32.mrb[4].mxu1 }
 0x105   : > { %v1114_v1 = vpop.f32.mrb[7].mxu0  ;;  %v863_v2 = vpop.f32.mrb[5].mxu1 }
 0x106   : > { %v856_v3 = vadd.f32 %v1186_v52, %v1112_v62  ;;  %v1115_v4 = vadd.f32 %v1114_v1, %v1113_v63  ;;  %v1191_v5 = vpop.f32.mrb[6].mxu1 }
 0x107   : > { %v866_v6 = vpop.f32.mrb[7].mxu1 }
 0x108   : > { %912 = vst [vmem:[%s1467_s8 + $0x10] sm:$0xff] %v856_v3  ;;  %v859_v7 = vadd.f32 %v1187_v57, %v1115_v4 }
 0x10a   : > { %913 = vst [vmem:[%s1467_s8 + $0x18] sm:$0xff] %v859_v7  ;;  %v1116_v8 = vpop.f32.mrb[8].mxu0 }
 0x10b   : > { %v1117_v9 = vpop.f32.mrb[9].mxu0 }
 0x10c   : > { %v1118_v10 = vadd.f32 %v1117_v9, %v1116_v8  ;;  %v1119_v11 = vpop.f32.mrb[10].mxu0  ;;  %v1194_v12 = vpop.f32.mrb[8].mxu1 }
 0x10d   : > { %v1120_v13 = vpop.f32.mrb[11].mxu0  ;;  %v879_v14 = vpop.f32.mrb[9].mxu1 }
 0x10e   : > { %v1121_v15 = vadd.f32 %v1120_v13, %v1119_v11  ;;  %v864_v16 = vadd.f32 %v1118_v10, %v863_v2  ;;  %v1195_v17 = vpop.f32.mrb[10].mxu1 }
 0x10f   : > { %v882_v18 = vpop.f32.mrb[11].mxu1 }
 0x110   : > { %914 = vst [vmem:[%s1467_s8 + $0x20] sm:$0xff] %v864_v16  ;;  %v867_v19 = vadd.f32 %v1121_v15, %v866_v6 }
 0x112   : > { %915 = vst [vmem:[%s1467_s8 + $0x28] sm:$0xff] %v867_v19  ;;  %v1122_v20 = vpop.f32.mrb[12].mxu0 }
 0x113   : > { %v1123_v21 = vpop.f32.mrb[13].mxu0 }
 0x114   : > { %v1124_v22 = vadd.f32 %v1123_v21, %v1122_v20  ;;  %v1125_v23 = vpop.f32.mrb[14].mxu0  ;;  %v1198_v24 = vpop.f32.mrb[12].mxu1 }
 0x115   : > { %v1126_v25 = vpop.f32.mrb[15].mxu0  ;;  %v895_v26 = vpop.f32.mrb[13].mxu1 }
 0x116   : > { %v872_v27 = vadd.f32 %v1190_v0, %v1124_v22  ;;  %v1127_v28 = vadd.f32 %v1126_v25, %v1125_v23  ;;  %v1199_v29 = vpop.f32.mrb[14].mxu1 }
 0x117   : > { %v898_v30 = vpop.f32.mrb[15].mxu1 }
 0x118   : > { %916 = vst [vmem:[%s1467_s8 + $0x30] sm:$0xff] %v872_v27  ;;  %v875_v31 = vadd.f32 %v1191_v5, %v1127_v28 }
 0x11a   : > { %917 = vst [vmem:[%s1467_s8 + $0x38] sm:$0xff] %v875_v31  ;;  %v1128_v32 = vpop.f32.mrb[16].mxu0 }
 0x11b   : > { %v1129_v33 = vpop.f32.mrb[17].mxu0 }
 0x11c   : > { %v1130_v34 = vadd.f32 %v1129_v33, %v1128_v32  ;;  %v1131_v35 = vpop.f32.mrb[18].mxu0 }
 0x11d   : > { %v1132_v36 = vpop.f32.mrb[19].mxu0 }
 0x11e   : > { %v1133_v37 = vadd.f32 %v1132_v36, %v1131_v35  ;;  %v880_v38 = vadd.f32 %v1130_v34, %v879_v14 }
 0x120   : > { %918 = vst [vmem:[%s1467_s8 + $0x40] sm:$0xff] %v880_v38  ;;  %v883_v39 = vadd.f32 %v1133_v37, %v882_v18 }
 0x122   : > { %919 = vst [vmem:[%s1467_s8 + $0x48] sm:$0xff] %v883_v39  ;;  %v1134_v40 = vpop.f32.mrb[20].mxu0 }
 0x123   : > { %v1135_v41 = vpop.f32.mrb[21].mxu0 }
 0x124   : > { %v1136_v42 = vadd.f32 %v1135_v41, %v1134_v40  ;;  %v1137_v43 = vpop.f32.mrb[22].mxu0 }
 0x125   : > { %v1138_v44 = vpop.f32.mrb[23].mxu0 }
 0x126   : > { %v888_v45 = vadd.f32 %v1194_v12, %v1136_v42  ;;  %v1139_v46 = vadd.f32 %v1138_v44, %v1137_v43 }
 0x128   : > { %920 = vst [vmem:[%s1467_s8 + $0x50] sm:$0xff] %v888_v45  ;;  %v891_v47 = vadd.f32 %v1195_v17, %v1139_v46 }
 0x12a   : > { %921 = vst [vmem:[%s1467_s8 + $0x58] sm:$0xff] %v891_v47  ;;  %v1140_v48 = vpop.f32.mrb[24].mxu0 }
 0x12b   : > { %v1141_v49 = vpop.f32.mrb[25].mxu0 }
 0x12c   : > { %v1142_v50 = vadd.f32 %v1141_v49, %v1140_v48  ;;  %v1143_v51 = vpop.f32.mrb[26].mxu0 }
 0x12d   : > { %v1144_v52 = vpop.f32.mrb[27].mxu0 }
 0x12e   : > { %v1145_v53 = vadd.f32 %v1144_v52, %v1143_v51  ;;  %v896_v54 = vadd.f32 %v1142_v50, %v895_v26 }
 0x130   : > { %922 = vst [vmem:[%s1467_s8 + $0x60] sm:$0xff] %v896_v54  ;;  %v899_v55 = vadd.f32 %v1145_v53, %v898_v30 }
 0x132   : > { %923 = vst [vmem:[%s1467_s8 + $0x68] sm:$0xff] %v899_v55  ;;  %v1146_v56 = vpop.f32.mrb[28].mxu0 }
 0x133   : > { %v1147_v57 = vpop.f32.mrb[29].mxu0 }
 0x134   : > { %v1148_v58 = vadd.f32 %v1147_v57, %v1146_v56  ;;  %v1149_v59 = vpop.f32.mrb[30].mxu0 }
 0x135   : > { %v1150_v60 = vpop.f32.mrb[31].mxu0 }
 0x136   : > { %v904_v61 = vadd.f32 %v1198_v24, %v1148_v58  ;;  %v1151_v62 = vadd.f32 %v1150_v60, %v1149_v59 }
 0x138   : > { %924 = vst [vmem:[%s1467_s8 + $0x70] sm:$0xff] %v904_v61  ;;  %v907_v63 = vadd.f32 %v1199_v29, %v1151_v62 }
 0x13a   : > { %925 = vst [vmem:[%s1467_s8 + $0x78] sm:$0xff] %v907_v63 }
 0x13b PF: > { %s14_s17 = sadd.s32 1, %s1302_s17   ;;  %s1499_s15 = smov %s1298_s16 }
 0x13c   : > { %p11_p5 = scmp.ge.s32.totalorder %s14_s17, 4   ;;  %s1500_s16 = smov %s1502_s18 }
 0x13e   :  { %13 = sbr.rel (!%p11_p5) target bundleno = 2 (0x2), region = 80 }

// kernel: spatial_gcn_forward.2
= control target key start
LH: loop header
LB: loop body
LE: loop exit
PB: predicated region body
PF: predicated region fallthrough
CT: control target
= control target key end

     0   :  { %s1746_s18 = smov 0   ;;  %s1748_s19 = smov 0   ;;  %s1996_s0 = inlined_call_operand.vmem [shape: bf16[256,128], index: 0, kind: input, shape index: {}]   ;;  %s1997_s1 = inlined_call_operand.vmem [shape: bf16[256,256], index: 1, kind: input, shape index: {}]   ;;  %s1998_s2 = inlined_call_operand.vmem [shape: bf16[256,128], index: 2, kind: input, shape index: {}]   ;;  %s1999_s3 = inlined_call_operand.vmem [shape: bf16[128,256], index: 3, kind: input, shape index: {}]   ;;  %s2000_s4 = inlined_call_operand.vmem [shape: bf16[128,256], index: 4, kind: input, shape index: {}]   ;;  %s2001_s5 = inlined_call_operand.vmem [shape: bf16[256,256], index: 5, kind: output, shape index: {}]  }
   0x1   :  { %s1750_s20 = smov 0  }
   0x2 LB: > { %s27_s21 = sadd.s32 1, %s1709_s19  ;;  %p1373_p0 = scmp.ge.s32.totalorder %s1713_s20, 1  ;;  %s1713_s20 = sphi %s1750_s20, %s15_s20   ;;  %s1709_s19 = sphi %s1748_s19, %s2003_s19   ;;  %s1705_s18 = sphi %s1746_s18, %s2002_s18  }
   0x3   : > { %p29_p1 = scmp.ge.s32.totalorder %s27_s21, 2  ;;  %p230_p2 = scmp.lt.s32.totalorder %s1713_s20, 3 }
   0x5   : > { %s2005_s21 = smov (%p29_p1, %s27_s21), 0  ;;  %p231_p3 = pnand %p1373_p0, %p230_p2 }
   0x6   : > { %v1595_v0 = vld [vmem:[%s1998_s2 + $0x40] sm:$0xff] (!%p231_p3)   ;;  %s1374_s24 = sshll.u32 (!%p231_p3), %s1705_s18, 4  ;;  %v1597_v2 = vld [vmem:[%s1998_s2 + $0x48] sm:$0xff] (!%p231_p3)   ;;  %v1599_v4 = vld [vmem:[%s1998_s2 + $0x50] sm:$0xff] (!%p231_p3)   ;;  %v1715_v48 = vmov (!%p231_p3), 0   ;;  %s1379_s28 = sshll.u32 (!%p231_p3), %s1705_s18, 3 }
   0x7   : > { %234 = sbr.rel (%p231_p3) target bundleno = 598 (0x256), region = 40  ;;  %v1596_v1 = vld [vmem:[%s1998_s2] sm:$0xff] (!%p231_p3)   ;;  %1458 = vmatprep.subr.bf16.mxu0 (!%p231_p3), %v1595_v0  ;;  %v1598_v3 = vld [vmem:[%s1998_s2 + $0x8] sm:$0xff] (!%p231_p3)   ;;  %p275_p4 = scmp.lt.s32.totalorder (!%p231_p3), %s1374_s24, 31  ;;  %v1600_v5 = vld [vmem:[%s1998_s2 + $0x10] sm:$0xff] (!%p231_p3)   ;;  %922 = vmatprep.mubr.bf16.mxu1 (!%p231_p3), %v1715_v48 }
   0x8   : > { %1459 = vmatpush3.bf16.msra.mxu0 (!%p231_p3), %v1596_v1  ;;  %v1601_v6 = vld [vmem:[%s1998_s2 + $0x58] sm:$0xff] (!%p231_p3)   ;;  %v1603_v8 = vld [vmem:[%s1998_s2 + $0x60] sm:$0xff] (!%p231_p3)   ;;  %v1605_v10 = vld [vmem:[%s1998_s2 + $0x68] sm:$0xff] (!%p231_p3)   ;;  %p299_p5 = scmp.lt.s32.totalorder (!%p231_p3), %s1379_s28, 15 }
   0x9   : > { %1460 = vmatprep.subr.bf16.mxu0 (!%p231_p3), %v1597_v2  ;;  %v1602_v7 = vld [vmem:[%s1998_s2 + $0x18] sm:$0xff] (!%p231_p3)   ;;  %v1604_v9 = vld [vmem:[%s1998_s2 + $0x20] sm:$0xff] (!%p231_p3)   ;;  %v1606_v12 = vld [vmem:[%s1998_s2 + $0x28] sm:$0xff] (!%p231_p3)  }
   0xa   : > { %v1607_v13 = vld [vmem:[%s1998_s2 + $0x70] sm:$0xff] (!%p231_p3)   ;;  %v1609_v15 = vld [vmem:[%s1998_s2 + $0x78] sm:$0xff] (!%p231_p3)   ;;  %v1637_v17 = vld [vmem:[%s2000_s4 + $0x4] ss:$8 sps:$4 sm:$0xff] (!%p231_p3)  }
   0xb   : > { %v1608_v14 = vld [vmem:[%s1998_s2 + $0x30] sm:$0xff] (!%p231_p3)   ;;  %v1610_v16 = vld [vmem:[%s1998_s2 + $0x38] sm:$0xff] (!%p231_p3)   ;;  %v1635_v18 = vld [vmem:[%s2000_s4] ss:$8 sps:$4 sm:$0xff] (!%p231_p3)   ;;  %1522 = vmatprep.subr.bf16.mxu1 (!%p231_p3), %v1637_v17 }
   0xc   : > { %1461 = vmatpush3.bf16.msra.mxu0 (!%p231_p3), %v1598_v3  ;;  %v1640_v19 = vld [vmem:[%s2000_s4 + $0x14] ss:$8 sps:$4 sm:$0xff] (!%p231_p3)   ;;  %1530 = vmatpush1.bf16.msra.mxu1 (!%p231_p3), %v1635_v18  ;;  %v1638_v22 = vld [vmem:[%s2000_s4 + $0x10] ss:$8 sps:$4 sm:$0xff] (!%p231_p3)   ;;  %v1641_v23 = vld [vmem:[%s2000_s4 + $0x20] ss:$8 sps:$4 sm:$0xff] (!%p231_p3)  }
   0xd   : > { %1462 = vmatprep.subr.bf16.mxu0 (!%p231_p3), %v1599_v4  ;;  %1523 = vmatprep.subr.bf16.mxu1 (!%p231_p3), %v1640_v19  ;;  %v1643_v24 = vld [vmem:[%s2000_s4 + $0x24] ss:$8 sps:$4 sm:$0xff] (!%p231_p3)   ;;  %v1646_v25 = vld [vmem:[%s2000_s4 + $0x34] ss:$8 sps:$4 sm:$0xff] (!%p231_p3)   ;;  %v1644_v28 = vld [vmem:[%s2000_s4 + $0x30] ss:$8 sps:$4 sm:$0xff] (!%p231_p3)  }
   0xe   : > { %s2007_s24 = smov (!%p275_p4, %s1374_s24), 31  ;;  %v1649_v29 = vld [vmem:[%s2000_s4 + $0x44] ss:$8 sps:$4 sm:$0xff]   ;;  %v1647_v30 = vld [vmem:[%s2000_s4 + $0x40] ss:$8 sps:$4 sm:$0xff]   ;;  %s2009_s28 = smov (!%p299_p5, %s1379_s28), 15 }
   0xf   : > { %s1456_s14 = sshll.u32 %s2007_s24, 3  ;;  %s1375_s9 = sshll.u32 %s2007_s24, 2  ;;  %v1652_v31 = vld [vmem:[%s2000_s4 + $0x54] ss:$8 sps:$4 sm:$0xff]   ;;  %v1650_v34 = vld [vmem:[%s2000_s4 + $0x50] ss:$8 sps:$4 sm:$0xff]  }
  0x10   : > { %1463 = vmatpush3.bf16.msra.mxu0 %v1600_v5  ;;  %s1800_s23 = scalar_lea.vmem %s1997_s1, %s1456_s14  ;;  %1531 = vmatpush1.bf16.msra.mxu1 %v1638_v22  ;;  %s1856_s14 = scalar_lea.vmem %s1996_s0, %s1375_s9  ;;  %v1655_v44 = vld [vmem:[%s2000_s4 + $0x64] ss:$8 sps:$4 sm:$0xff]   ;;  %v1653_v45 = vld [vmem:[%s2000_s4 + $0x60] ss:$8 sps:$4 sm:$0xff]   ;;  %v1658_v46 = vld [vmem:[%s2000_s4 + $0x74] ss:$8 sps:$4 sm:$0xff]  }
  0x11   : > { %1464 = vmatprep.subr.bf16.mxu0 %v1601_v6  ;;  %v1613_v11 = vld [vmem:[%s1800_s23 + $0x4] ss:$8 sps:$4 sm:$0xff]   ;;  %v1611_v20 = vld [vmem:[%s1800_s23] ss:$8 sps:$4 sm:$0xff]   ;;  %v1614_v21 = vld [vmem:[%s1800_s23 + $0x14] ss:$8 sps:$4 sm:$0xff]   ;;  %1524 = vmatprep.subr.bf16.mxu1 %v1643_v24 }
  0x12   : > { %598 = vmatprep.mubr.bf16.mxu0 %v1613_v11  ;;  %v1616_v26 = vld [vmem:[%s1800_s23 + $0x10] ss:$8 sps:$4 sm:$0xff]   ;;  %v1617_v27 = vld [vmem:[%s1800_s23 + $0x24] ss:$8 sps:$4 sm:$0xff]   ;;  %v1619_v32 = vld [vmem:[%s1800_s23 + $0x20] ss:$8 sps:$4 sm:$0xff]  }
  0x13   : > { %v1620_v33 = vld [vmem:[%s1800_s23 + $0x34] ss:$8 sps:$4 sm:$0xff]   ;;  %v1622_v35 = vld [vmem:[%s1800_s23 + $0x30] ss:$8 sps:$4 sm:$0xff]   ;;  %v1623_v36 = vld [vmem:[%s1800_s23 + $0x44] ss:$8 sps:$4 sm:$0xff]  }
  0x14   : > { %1465 = vmatpush3.bf16.msra.mxu0 %v1602_v7  ;;  %1532 = vmatpush1.bf16.msra.mxu1 %v1641_v23  ;;  %v1625_v37 = vld [vmem:[%s1800_s23 + $0x40] ss:$8 sps:$4 sm:$0xff]   ;;  %v1626_v38 = vld [vmem:[%s1800_s23 + $0x54] ss:$8 sps:$4 sm:$0xff]   ;;  %v1628_v39 = vld [vmem:[%s1800_s23 + $0x50] ss:$8 sps:$4 sm:$0xff]  }
  0x15   : > { %1466 = vmatprep.subr.bf16.mxu0 %v1603_v8  ;;  %1525 = vmatprep.subr.bf16.mxu1 %v1646_v25  ;;  %v1629_v40 = vld [vmem:[%s1800_s23 + $0x64] ss:$8 sps:$4 sm:$0xff]   ;;  %v1631_v41 = vld [vmem:[%s1800_s23 + $0x60] ss:$8 sps:$4 sm:$0xff]   ;;  %v1632_v42 = vld [vmem:[%s1800_s23 + $0x74] ss:$8 sps:$4 sm:$0xff]  }
  0x16   : > { %v1634_v43 = vld [vmem:[%s1800_s23 + $0x70] ss:$8 sps:$4 sm:$0xff]   ;;  %v1661_v49 = vld [vmem:[%s1999_s3 + $0x4] ss:$8 sps:$4 sm:$0xff]  }
  0x17   : > { %v1656_v47 = vld [vmem:[%s2000_s4 + $0x70] ss:$8 sps:$4 sm:$0xff]  }
  0x18   : > { %1467 = vmatpush3.bf16.msra.mxu0 %v1604_v9  ;;  %1533 = vmatpush1.bf16.msra.mxu1 %v1644_v28 }
  0x19   : > { %1468 = vmatprep.subr.bf16.mxu0 %v1605_v10  ;;  %1526 = vmatprep.subr.bf16.mxu1 %v1649_v29 }
  0x1c   : > { %1469 = vmatpush3.bf16.msra.mxu0 %v1606_v12  ;;  %1534 = vmatpush1.bf16.msra.mxu1 %v1647_v30 }
  0x1d   : > { %1470 = vmatprep.subr.bf16.mxu0 %v1607_v13  ;;  %1527 = vmatprep.subr.bf16.mxu1 %v1652_v31 }
  0x20   : > { %1471 = vmatpush3.bf16.msra.mxu0 %v1608_v14  ;;  %1535 = vmatpush1.bf16.msra.mxu1 %v1650_v34 }
  0x21   : > { %1472 = vmatprep.subr.bf16.mxu0 %v1609_v15  ;;  %1528 = vmatprep.subr.bf16.mxu1 %v1655_v44 }
  0x24   : > { %1473 = vmatpush3.bf16.msra.mxu0 %v1610_v16  ;;  %1536 = vmatpush1.bf16.msra.mxu1 %v1653_v45 }
  0x25   : > { %850 = vmatprep.subr.bf16.mxu0 %v1637_v17  ;;  %1529 = vmatprep.subr.bf16.mxu1 %v1658_v46 }
  0x27   : > { %599 = vmatmul.mubr.bf16.vlgmr.msra.gmra.mrb[0].mxu0 %v1611_v20  ;;  %v1659_v20 = vld [vmem:[%s1999_s3] ss:$8 sps:$4 sm:$0xff]  }
  0x28   : > { %606 = vmatprep.mubr.bf16.mxu0 %v1614_v21  ;;  %851 = vmatpush1.bf16.msra.mxu0 %v1635_v18 }
  0x29   : > { %852 = vmatprep.subr.bf16.mxu0 %v1640_v19  ;;  %1537 = vmatpush1.bf16.msra.mxu1 %v1656_v47 }
  0x2a   : > { %1091 = vmatprep.subr.bf16.mxu1 %v1661_v49 }
  0x2c   : > { %853 = vmatpush1.bf16.msra.mxu0 %v1638_v22  ;;  %v1664_v22 = vld [vmem:[%s1999_s3 + $0x14] ss:$8 sps:$4 sm:$0xff]  }
  0x2d   : > { %854 = vmatprep.subr.bf16.mxu0 %v1643_v24 }
  0x2f   : > { %607 = vmatmul.mubr.bf16.gmra.mrb[4].mxu0 %v1616_v26 }
  0x30   : > { %614 = vmatprep.mubr.bf16.mxu0 %v1617_v27  ;;  %855 = vmatpush1.bf16.msra.mxu0 %v1641_v23 }
  0x31   : > { %856 = vmatprep.subr.bf16.mxu0 %v1646_v25  ;;  %v1662_v25 = vld [vmem:[%s1999_s3 + $0x10] ss:$8 sps:$4 sm:$0xff]  }
  0x34   : > { %857 = vmatpush1.bf16.msra.mxu0 %v1644_v28  ;;  %v1667_v28 = vld [vmem:[%s1999_s3 + $0x24] ss:$8 sps:$4 sm:$0xff]  }
  0x35   : > { %858 = vmatprep.subr.bf16.mxu0 %v1649_v29 }
  0x37   : > { %615 = vmatmul.mubr.bf16.gmra.mrb[8].mxu0 %v1619_v32 }
  0x38   : > { %622 = vmatprep.mubr.bf16.mxu0 %v1620_v33  ;;  %859 = vmatpush1.bf16.msra.mxu0 %v1647_v30  ;;  %v1670_v33 = vld [vmem:[%s1999_s3 + $0x34] ss:$8 sps:$4 sm:$0xff]  }
  0x39   : > { %860 = vmatprep.subr.bf16.mxu0 %v1652_v31  ;;  %v1665_v31 = vld [vmem:[%s1999_s3 + $0x20] ss:$8 sps:$4 sm:$0xff]  }
  0x3c   : > { %861 = vmatpush1.bf16.msra.mxu0 %v1650_v34 }
  0x3d   : > { %862 = vmatprep.subr.bf16.mxu0 %v1655_v44  ;;  %v1676_v44 = vld [vmem:[%s1999_s3 + $0x54] ss:$8 sps:$4 sm:$0xff]  }
  0x3f   : > { %623 = vmatmul.mubr.bf16.gmra.mrb[12].mxu0 %v1622_v35 }
  0x40   : > { %630 = vmatprep.mubr.bf16.mxu0 %v1623_v36  ;;  %863 = vmatpush1.bf16.msra.mxu0 %v1653_v45  ;;  %v1668_v36 = vld [vmem:[%s1999_s3 + $0x30] ss:$8 sps:$4 sm:$0xff]  }
  0x41   : > { %864 = vmatprep.subr.bf16.mxu0 %v1658_v46 }
  0x44   : > { %865 = vmatpush1.bf16.msra.mxu0 %v1656_v47  ;;  %v1674_v47 = vld [vmem:[%s1999_s3 + $0x50] ss:$8 sps:$4 sm:$0xff]  }
  0x47   : > { %631 = vmatmul.mubr.bf16.gmra.mrb[16].mxu0 %v1625_v37 }
  0x48   : > { %638 = vmatprep.mubr.bf16.mxu0 %v1626_v38 }
  0x4f   : > { %639 = vmatmul.mubr.bf16.gmra.mrb[20].mxu0 %v1628_v39  ;;  %v1673_v39 = vld [vmem:[%s1999_s3 + $0x44] ss:$8 sps:$4 sm:$0xff]  }
  0x50   : > { %646 = vmatprep.mubr.bf16.mxu0 %v1629_v40 }
  0x57   : > { %647 = vmatmul.mubr.bf16.gmra.mrb[24].mxu0 %v1631_v41 }
  0x58   : > { %654 = vmatprep.mubr.bf16.mxu0 %v1632_v42  ;;  %v1671_v42 = vld [vmem:[%s1999_s3 + $0x40] ss:$8 sps:$4 sm:$0xff]  }
  0x5f   : > { %655 = vmatmul.mubr.bf16.gmra.mrb[28].mxu0 %v1634_v43 }
  0x60   : > { %882 = vmatprep.mubr.bf16.mxu0 %v1715_v48 }
  0xfa   : > { %v1474_v50 = vpop.f32.mrb[0].mxu0 }
  0xfb   : > { %v1475_v51 = vpop.f32.mrb[1].mxu0 }
  0xfc   : > { %v1476_v52 = vadd.f32 %v1475_v51, %v1474_v50  ;;  %v1477_v53 = vpop.f32.mrb[2].mxu0  ;;  %v1679_v51 = vld [vmem:[%s1999_s3 + $0x64] ss:$8 sps:$4 sm:$0xff]  }
  0xfd   : > { %v1478_v54 = vpop.f32.mrb[3].mxu0 }
  0xfe   : > { %v1479_v55 = vadd.f32 %v1478_v54, %v1477_v53  ;;  %v1677_v54 = vld [vmem:[%s1999_s3 + $0x60] ss:$8 sps:$4 sm:$0xff]  }
 0x100   : > { %v746_v56 = vpack.c.bf16 %v1479_v55, %v1476_v52 }
 0x102   : > { %v1480_v57 = vpop.f32.mrb[4].mxu0  ;;  %883 = vmatmul.mubr.bf16.vlgmr.msra.gmra.mrb[32].mxu0 %v746_v56  ;;  %v1682_v56 = vld [vmem:[%s1999_s3 + $0x74] ss:$8 sps:$4 sm:$0xff]  }
 0x103   : > { %v1481_v58 = vpop.f32.mrb[5].mxu0  ;;  %892 = vmatprep.mubr.bf16.mxu0 %v1715_v48 }
 0x104   : > { %v1482_v59 = vadd.f32 %v1481_v58, %v1480_v57  ;;  %v1483_v60 = vpop.f32.mrb[6].mxu0  ;;  %v1680_v57 = vld [vmem:[%s1999_s3 + $0x70] ss:$8 sps:$4 sm:$0xff]   ;;  %v1683_v58 = vld [vmem:[%s1856_s14] sm:$0xff]  }
 0x105   : > { %v1484_v61 = vpop.f32.mrb[7].mxu0 }
 0x106   : > { %v1485_v62 = vadd.f32 %v1484_v61, %v1483_v60  ;;  %v1685_v60 = vld [vmem:[%s1856_s14 + $0x10] sm:$0xff]   ;;  %v1686_v61 = vld [vmem:[%s1856_s14 + $0x18] sm:$0xff]  }
 0x108   : > { %v747_v63 = vpack.c.bf16 %v1485_v62, %v1482_v59  ;;  %v1684_v59 = vld [vmem:[%s1856_s14 + $0x8] sm:$0xff]   ;;  %v1687_v62 = vld [vmem:[%s1856_s14 + $0x20] sm:$0xff]  }
 0x10a   : > { %v1486_v0 = vpop.f32.mrb[8].mxu0  ;;  %893 = vmatmul.mubr.bf16.gmra.mrb[36].mxu0 %v747_v63  ;;  %v1688_v63 = vld [vmem:[%s1856_s14 + $0x28] sm:$0xff]  }
 0x10b   : > { %v1487_v1 = vpop.f32.mrb[9].mxu0  ;;  %902 = vmatprep.mubr.bf16.mxu0 %v1715_v48 }
 0x10c   : > { %v1488_v2 = vadd.f32 %v1487_v1, %v1486_v0  ;;  %v1489_v3 = vpop.f32.mrb[10].mxu0  ;;  %v1689_v0 = vld [vmem:[%s1856_s14 + $0x30] sm:$0xff]   ;;  %v1690_v1 = vld [vmem:[%s1856_s14 + $0x38] sm:$0xff]   ;;  %s1457_s14 = sshll.u32 %s2009_s28, 4 }
 0x10d   : > { %v1490_v4 = vpop.f32.mrb[11].mxu0  ;;  %s1969_s6 = scalar_lea.vmem %s2001_s5, %s1457_s14 }
 0x10e   : > { %v1491_v5 = vadd.f32 %v1490_v4, %v1489_v3 }
 0x110   : > { %v748_v6 = vpack.c.bf16 %v1491_v5, %v1488_v2 }
 0x112   : > { %v1492_v7 = vpop.f32.mrb[12].mxu0  ;;  %903 = vmatmul.mubr.bf16.gmra.mrb[40].mxu0 %v748_v6 }
 0x113   : > { %v1493_v8 = vpop.f32.mrb[13].mxu0  ;;  %912 = vmatprep.mubr.bf16.mxu0 %v1715_v48 }
 0x114   : > { %v1494_v9 = vadd.f32 %v1493_v8, %v1492_v7  ;;  %v1495_v10 = vpop.f32.mrb[14].mxu0 }
 0x115   : > { %v1496_v11 = vpop.f32.mrb[15].mxu0 }
 0x116   : > { %v1497_v12 = vadd.f32 %v1496_v11, %v1495_v10 }
 0x118   : > { %v749_v13 = vpack.c.bf16 %v1497_v12, %v1494_v9 }
 0x11a   : > { %v1498_v14 = vpop.f32.mrb[16].mxu0  ;;  %913 = vmatmul.mubr.bf16.gmra.mrb[44].mxu0 %v749_v13 }
 0x11b   : > { %v1499_v15 = vpop.f32.mrb[17].mxu0 }
 0x11c   : > { %v1500_v16 = vadd.f32 %v1499_v15, %v1498_v14  ;;  %v1501_v17 = vpop.f32.mrb[18].mxu0 }
 0x11d   : > { %v1502_v18 = vpop.f32.mrb[19].mxu0 }
 0x11e   : > { %v1503_v19 = vadd.f32 %v1502_v18, %v1501_v17 }
 0x120   : > { %v750_v21 = vpack.c.bf16 %v1503_v19, %v1500_v16 }
 0x122   : > { %v1504_v23 = vpop.f32.mrb[20].mxu0  ;;  %923 = vmatmul.mubr.bf16.vlgmr.msra.gmra.mrb[0].mxu1 %v750_v21 }
 0x123   : > { %1092 = vmatpush1.bf16.msra.mxu1 %v1659_v20  ;;  %v1505_v24 = vpop.f32.mrb[21].mxu0  ;;  %932 = vmatprep.mubr.bf16.mxu1 %v1715_v48 }
 0x124   : > { %v1506_v26 = vadd.f32 %v1505_v24, %v1504_v23  ;;  %v1507_v27 = vpop.f32.mrb[22].mxu0  ;;  %1093 = vmatprep.subr.bf16.mxu1 %v1664_v22 }
 0x125   : > { %v1508_v29 = vpop.f32.mrb[23].mxu0 }
 0x126   : > { %v1509_v30 = vadd.f32 %v1508_v29, %v1507_v27 }
 0x127   : > { %1094 = vmatpush1.bf16.msra.mxu1 %v1662_v25 }
 0x128   : > { %v751_v32 = vpack.c.bf16 %v1509_v30, %v1506_v26  ;;  %1095 = vmatprep.subr.bf16.mxu1 %v1667_v28 }
 0x12a   : > { %v1510_v34 = vpop.f32.mrb[24].mxu0  ;;  %933 = vmatmul.mubr.bf16.gmra.mrb[4].mxu1 %v751_v32 }
 0x12b   : > { %1096 = vmatpush1.bf16.msra.mxu1 %v1665_v31  ;;  %v1511_v35 = vpop.f32.mrb[25].mxu0  ;;  %942 = vmatprep.mubr.bf16.mxu1 %v1715_v48 }
 0x12c   : > { %v1512_v37 = vadd.f32 %v1511_v35, %v1510_v34  ;;  %v1513_v38 = vpop.f32.mrb[26].mxu0  ;;  %1097 = vmatprep.subr.bf16.mxu1 %v1670_v33 }
 0x12d   : > { %v1514_v40 = vpop.f32.mrb[27].mxu0 }
 0x12e   : > { %v1515_v41 = vadd.f32 %v1514_v40, %v1513_v38 }
 0x12f   : > { %1098 = vmatpush1.bf16.msra.mxu1 %v1668_v36 }
 0x130   : > { %v752_v43 = vpack.c.bf16 %v1515_v41, %v1512_v37  ;;  %1099 = vmatprep.subr.bf16.mxu1 %v1673_v39 }
 0x132   : > { %v1516_v45 = vpop.f32.mrb[28].mxu0  ;;  %943 = vmatmul.mubr.bf16.gmra.mrb[8].mxu1 %v752_v43 }
 0x133   : > { %1100 = vmatpush1.bf16.msra.mxu1 %v1671_v42  ;;  %v1517_v46 = vpop.f32.mrb[29].mxu0  ;;  %952 = vmatprep.mubr.bf16.mxu1 %v1715_v48 }
 0x134   : > { %v1518_v49 = vadd.f32 %v1517_v46, %v1516_v45  ;;  %v1519_v50 = vpop.f32.mrb[30].mxu0  ;;  %1101 = vmatprep.subr.bf16.mxu1 %v1676_v44 }
 0x135   : > { %v1520_v52 = vpop.f32.mrb[31].mxu0 }
 0x136   : > { %v1521_v53 = vadd.f32 %v1520_v52, %v1519_v50 }
 0x137   : > { %1102 = vmatpush1.bf16.msra.mxu1 %v1674_v47 }
 0x138   : > { %v753_v55 = vpack.c.bf16 %v1521_v53, %v1518_v49  ;;  %1103 = vmatprep.subr.bf16.mxu1 %v1679_v51 }
 0x13a   : > { %953 = vmatmul.mubr.bf16.gmra.mrb[12].mxu1 %v753_v55 }
 0x13b   : > { %1104 = vmatpush1.bf16.msra.mxu1 %v1677_v54  ;;  %1123 = vmatprep.mubr.bf16.mxu1 %v1715_v48 }
 0x13c   : > { %1105 = vmatprep.subr.bf16.mxu1 %v1682_v56 }
 0x13f   : > { %1106 = vmatpush1.bf16.msra.mxu1 %v1680_v57 }
 0x142   : > { %1124 = vmatmul.mubr.bf16.vlgmr.msra.gmra.mrb[16].mxu1 %v1683_v58 }
 0x143   : > { %1133 = vmatprep.mubr.bf16.mxu1 %v1715_v48 }
 0x14a   : > { %1134 = vmatmul.mubr.bf16.gmra.mrb[20].mxu1 %v1684_v59 }
 0x14b   : > { %1143 = vmatprep.mubr.bf16.mxu1 %v1715_v48 }
 0x152   : > { %1144 = vmatmul.mubr.bf16.gmra.mrb[24].mxu1 %v1685_v60 }
 0x153   : > { %1153 = vmatprep.mubr.bf16.mxu1 %v1715_v48 }
 0x15a   : > { %1154 = vmatmul.mubr.bf16.gmra.mrb[28].mxu1 %v1686_v61 }
 0x15b   : > { %1163 = vmatprep.mubr.bf16.mxu1 %v1715_v48 }
 0x162   : > { %1164 = vmatmul.mubr.bf16.gmra.mrb[0].mxu1 %v1687_v62 }
 0x163   : > { %1173 = vmatprep.mubr.bf16.mxu1 %v1715_v48 }
 0x16a   : > { %1174 = vmatmul.mubr.bf16.gmra.mrb[4].mxu1 %v1688_v63 }
 0x16b   : > { %1183 = vmatprep.mubr.bf16.mxu1 %v1715_v48 }
 0x172   : > { %1184 = vmatmul.mubr.bf16.gmra.mrb[8].mxu1 %v1689_v0 }
 0x173   : > { %1193 = vmatprep.mubr.bf16.mxu1 %v1715_v48 }
 0x17a   : > { %1194 = vmatmul.mubr.bf16.gmra.mrb[12].mxu1 %v1690_v1 }
 0x1d5   : > { %v884_v2 = vpop.f32.mrb[32].mxu0 }
 0x1d6   : > { %v886_v3 = vpop.f32.mrb[33].mxu0 }
 0x1d7   : > { %v888_v4 = vpop.f32.mrb[34].mxu0 }
 0x1d8   : > { %v890_v5 = vpop.f32.mrb[35].mxu0 }
 0x1dd   : > { %v894_v6 = vpop.f32.mrb[36].mxu0 }
 0x1de   : > { %v896_v7 = vpop.f32.mrb[37].mxu0 }
 0x1df   : > { %v898_v8 = vpop.f32.mrb[38].mxu0 }
 0x1e0   : > { %v900_v9 = vpop.f32.mrb[39].mxu0 }
 0x1e5   : > { %v904_v10 = vpop.f32.mrb[40].mxu0 }
 0x1e6   : > { %v906_v11 = vpop.f32.mrb[41].mxu0 }
 0x1e7   : > { %v908_v12 = vpop.f32.mrb[42].mxu0 }
 0x1e8   : > { %v910_v13 = vpop.f32.mrb[43].mxu0 }
 0x1ed   : > { %v914_v14 = vpop.f32.mrb[44].mxu0 }
 0x1ee   : > { %v916_v15 = vpop.f32.mrb[45].mxu0 }
 0x1ef   : > { %v918_v16 = vpop.f32.mrb[46].mxu0 }
 0x1f0   : > { %v920_v17 = vpop.f32.mrb[47].mxu0 }
 0x215   : > { %v1125_v48 = vpop.f32.mrb[16].mxu1 }
 0x216   : > { %v1126_v18 = vadd.f32 %v1125_v48, %v884_v2  ;;  %v1127_v19 = vpop.f32.mrb[17].mxu1 }
 0x217   : > { %v1128_v20 = vadd.f32 %v1127_v19, %v886_v3  ;;  %v1129_v21 = vpop.f32.mrb[18].mxu1 }
 0x218   : > { %v1130_v22 = vadd.f32 %v1129_v21, %v888_v4  ;;  %v1131_v23 = vpop.f32.mrb[19].mxu1  ;;  %v1204_v25 = vmax.f32 %v1126_v18, 0.0 }
 0x219   : > { %v1132_v24 = vadd.f32 %v1131_v23, %v890_v5  ;;  %v1205_v27 = vmax.f32 %v1128_v20, 0.0 }
 0x21a   : > { %v1206_v26 = vmax.f32 %v1130_v22, 0.0 }
 0x21b   : > { %v1207_v28 = vmax.f32 %v1132_v24, 0.0 }
 0x21c   : > { %v1236_v29 = vpack.c.bf16 %v1206_v26, %v1204_v25 }
 0x21d   : > { %v1237_v30 = vpack.c.bf16 %v1207_v28, %v1205_v27  ;;  %v1135_v31 = vpop.f32.mrb[20].mxu1 }
 0x21e   : > { %1252 = vst [vmem:[%s1969_s6] sm:$0xff] %v1236_v29  ;;  %v1136_v32 = vadd.f32 %v1135_v31, %v894_v6  ;;  %v1137_v33 = vpop.f32.mrb[21].mxu1 }
 0x21f   : > { %1253 = vst [vmem:[%s1969_s6 + $0x8] sm:$0xff] %v1237_v30  ;;  %v1138_v34 = vadd.f32 %v1137_v33, %v896_v7  ;;  %v1139_v35 = vpop.f32.mrb[22].mxu1 }
 0x220   : > { %v1140_v36 = vadd.f32 %v1139_v35, %v898_v8  ;;  %v1141_v37 = vpop.f32.mrb[23].mxu1  ;;  %v1208_v39 = vmax.f32 %v1136_v32, 0.0 }
 0x221   : > { %v1142_v38 = vadd.f32 %v1141_v37, %v900_v9  ;;  %v1209_v41 = vmax.f32 %v1138_v34, 0.0 }
 0x222   : > { %v1210_v40 = vmax.f32 %v1140_v36, 0.0 }
 0x223   : > { %v1211_v42 = vmax.f32 %v1142_v38, 0.0 }
 0x224   : > { %v1238_v43 = vpack.c.bf16 %v1210_v40, %v1208_v39 }
 0x225   : > { %v1239_v44 = vpack.c.bf16 %v1211_v42, %v1209_v41  ;;  %v1145_v45 = vpop.f32.mrb[24].mxu1 }
 0x226   : > { %1254 = vst [vmem:[%s1969_s6 + $0x10] sm:$0xff] %v1238_v43  ;;  %v1146_v46 = vadd.f32 %v1145_v45, %v904_v10  ;;  %v1147_v47 = vpop.f32.mrb[25].mxu1 }
 0x227   : > { %1255 = vst [vmem:[%s1969_s6 + $0x18] sm:$0xff] %v1239_v44  ;;  %v1148_v49 = vadd.f32 %v1147_v47, %v906_v11  ;;  %v1149_v50 = vpop.f32.mrb[26].mxu1 }
 0x228   : > { %v1150_v51 = vadd.f32 %v1149_v50, %v908_v12  ;;  %v1151_v52 = vpop.f32.mrb[27].mxu1  ;;  %v1212_v54 = vmax.f32 %v1146_v46, 0.0 }
 0x229   : > { %v1152_v53 = vadd.f32 %v1151_v52, %v910_v13  ;;  %v1213_v56 = vmax.f32 %v1148_v49, 0.0 }
 0x22a   : > { %v1214_v55 = vmax.f32 %v1150_v51, 0.0 }
 0x22b   : > { %v1215_v57 = vmax.f32 %v1152_v53, 0.0 }
 0x22c   : > { %v1240_v58 = vpack.c.bf16 %v1214_v55, %v1212_v54 }
 0x22d   : > { %v1241_v59 = vpack.c.bf16 %v1215_v57, %v1213_v56  ;;  %v1155_v60 = vpop.f32.mrb[28].mxu1 }
 0x22e   : > { %1256 = vst [vmem:[%s1969_s6 + $0x20] sm:$0xff] %v1240_v58  ;;  %v1156_v61 = vadd.f32 %v1155_v60, %v914_v14  ;;  %v1157_v62 = vpop.f32.mrb[29].mxu1 }
 0x22f   : > { %1257 = vst [vmem:[%s1969_s6 + $0x28] sm:$0xff] %v1241_v59  ;;  %v1158_v63 = vadd.f32 %v1157_v62, %v916_v15  ;;  %v1159_v0 = vpop.f32.mrb[30].mxu1 }
 0x230   : > { %v1160_v1 = vadd.f32 %v1159_v0, %v918_v16  ;;  %v1161_v2 = vpop.f32.mrb[31].mxu1  ;;  %v1216_v4 = vmax.f32 %v1156_v61, 0.0 }
 0x231   : > { %v1162_v3 = vadd.f32 %v1161_v2, %v920_v17  ;;  %v1217_v6 = vmax.f32 %v1158_v63, 0.0 }
 0x232   : > { %v1218_v5 = vmax.f32 %v1160_v1, 0.0 }
 0x233   : > { %v1219_v7 = vmax.f32 %v1162_v3, 0.0 }
 0x234   : > { %v1242_v8 = vpack.c.bf16 %v1218_v5, %v1216_v4 }
 0x235   : > { %v1243_v9 = vpack.c.bf16 %v1219_v7, %v1217_v6  ;;  %v1165_v10 = vpop.f32.mrb[0].mxu1 }
 0x236   : > { %1258 = vst [vmem:[%s1969_s6 + $0x30] sm:$0xff] %v1242_v8  ;;  %v1167_v11 = vpop.f32.mrb[1].mxu1  ;;  %v1220_v13 = vmax.f32 %v1165_v10, 0.0 }
 0x237   : > { %1259 = vst [vmem:[%s1969_s6 + $0x38] sm:$0xff] %v1243_v9  ;;  %v1169_v12 = vpop.f32.mrb[2].mxu1  ;;  %v1221_v48 = vmax.f32 %v1167_v11, 0.0 }
 0x238   : > { %v1222_v14 = vmax.f32 %v1169_v12, 0.0  ;;  %v1171_v15 = vpop.f32.mrb[3].mxu1 }
 0x239   : > { %v1223_v16 = vmax.f32 %v1171_v15, 0.0 }
 0x23a   : > { %v1244_v17 = vpack.c.bf16 %v1222_v14, %v1220_v13 }
 0x23b   : > { %v1245_v18 = vpack.c.bf16 %v1223_v16, %v1221_v48 }
 0x23c   : > { %1260 = vst [vmem:[%s1969_s6 + $0x40] sm:$0xff] %v1244_v17 }
 0x23d   : > { %1261 = vst [vmem:[%s1969_s6 + $0x48] sm:$0xff] %v1245_v18  ;;  %v1175_v19 = vpop.f32.mrb[4].mxu1 }
 0x23e   : > { %v1177_v20 = vpop.f32.mrb[5].mxu1  ;;  %v1224_v22 = vmax.f32 %v1175_v19, 0.0 }
 0x23f   : > { %v1179_v21 = vpop.f32.mrb[6].mxu1  ;;  %v1225_v25 = vmax.f32 %v1177_v20, 0.0 }
 0x240   : > { %v1226_v23 = vmax.f32 %v1179_v21, 0.0  ;;  %v1181_v24 = vpop.f32.mrb[7].mxu1 }
 0x241   : > { %v1227_v26 = vmax.f32 %v1181_v24, 0.0 }
 0x242   : > { %v1246_v27 = vpack.c.bf16 %v1226_v23, %v1224_v22 }
 0x243   : > { %v1247_v28 = vpack.c.bf16 %v1227_v26, %v1225_v25 }
 0x244   : > { %1262 = vst [vmem:[%s1969_s6 + $0x50] sm:$0xff] %v1246_v27 }
 0x245   : > { %1263 = vst [vmem:[%s1969_s6 + $0x58] sm:$0xff] %v1247_v28  ;;  %v1185_v29 = vpop.f32.mrb[8].mxu1 }
 0x246   : > { %v1187_v30 = vpop.f32.mrb[9].mxu1  ;;  %v1228_v32 = vmax.f32 %v1185_v29, 0.0 }
 0x247   : > { %v1189_v31 = vpop.f32.mrb[10].mxu1  ;;  %v1229_v35 = vmax.f32 %v1187_v30, 0.0 }
 0x248   : > { %v1230_v33 = vmax.f32 %v1189_v31, 0.0  ;;  %v1191_v34 = vpop.f32.mrb[11].mxu1 }
 0x249   : > { %v1231_v36 = vmax.f32 %v1191_v34, 0.0 }
 0x24a   : > { %v1248_v37 = vpack.c.bf16 %v1230_v33, %v1228_v32 }
 0x24b   : > { %v1249_v38 = vpack.c.bf16 %v1231_v36, %v1229_v35 }
 0x24c   : > { %1264 = vst [vmem:[%s1969_s6 + $0x60] sm:$0xff] %v1248_v37 }
 0x24d   : > { %1265 = vst [vmem:[%s1969_s6 + $0x68] sm:$0xff] %v1249_v38  ;;  %v1195_v39 = vpop.f32.mrb[12].mxu1 }
 0x24e   : > { %v1197_v40 = vpop.f32.mrb[13].mxu1  ;;  %v1232_v42 = vmax.f32 %v1195_v39, 0.0 }
 0x24f   : > { %v1199_v41 = vpop.f32.mrb[14].mxu1  ;;  %v1233_v45 = vmax.f32 %v1197_v40, 0.0 }
 0x250   : > { %v1234_v43 = vmax.f32 %v1199_v41, 0.0  ;;  %v1201_v44 = vpop.f32.mrb[15].mxu1 }
 0x251   : > { %v1235_v46 = vmax.f32 %v1201_v44, 0.0 }
 0x252   : > { %v1250_v47 = vpack.c.bf16 %v1234_v43, %v1232_v42 }
 0x253   : > { %v1251_v49 = vpack.c.bf16 %v1235_v46, %v1233_v45 }
 0x254   : > { %1266 = vst [vmem:[%s1969_s6 + $0x70] sm:$0xff] %v1250_v47 }
 0x255   : > { %1267 = vst [vmem:[%s1969_s6 + $0x78] sm:$0xff] %v1251_v49 }
 0x256 PF: > { %s15_s20 = sadd.s32 1, %s1713_s20   ;;  %s2002_s18 = smov %s1709_s19 }
 0x257   : > { %p12_p6 = scmp.ge.s32.totalorder %s15_s20, 4   ;;  %s2003_s19 = smov %s2005_s21 }
 0x259   :  { %14 = sbr.rel (!%p12_p6) target bundleno = 2 (0x2), region = 84 }

</bundles_post_ra>
